<compile_context>
chip_gen: v6e
topology: v6e:2x2x1
jax: 0.10.0
libtpu: 0.0.40
codegen_flags: <defaults>
</compile_context>

<pallas_src>
import jax
import jax.numpy as jnp
from jax.experimental import pallas as pl
from jax.experimental.pallas import tpu as pltpu

LANE = 128
SUBLANE_PACK = 16  # keeps bf16 (packed-sublane) tile offsets aligned


def _round_up(n, m):
    return (n + m - 1) // m * m


def qnet_kernel(x_ref, w1_ref, b1_ref, w2_ref, b2_ref, w3_ref, b3_ref, o_ref):
    cdt = w1_ref.dtype  # matmul operand dtype (bf16 by default, f32 optional)
    # fc1 + relu: MXU matmul with f32 accumulate; bias/ReLU in f32 on the VPU.
    h1 = jnp.dot(x_ref[...], w1_ref[...], preferred_element_type=jnp.float32)
    h1 = jnp.maximum(h1 + b1_ref[...], 0.0)
    # fc2 + relu
    h2 = jnp.dot(h1.astype(cdt), w2_ref[...], preferred_element_type=jnp.float32)
    h2 = jnp.maximum(h2 + b2_ref[...], 0.0)
    # fc3 (no activation) -- output block is (TB, out_dim), unpadded on lanes.
    out = jnp.dot(h2.astype(cdt), w3_ref[...], preferred_element_type=jnp.float32)
    o_ref[...] = (out + b3_ref[...]).astype(o_ref.dtype)


def prepare_params(params, *, compute_dtype=jnp.bfloat16):
    """Pad hidden width to 128 lanes and cast weights once (outside the hot path).

    Padded hidden columns get zero weight + zero bias -> relu(0) = 0 feeding
    zero rows of the next weight, so results match the unpadded computation.
    The OUTPUT axis of w3/b3 is left unpadded (lane-narrow store is cheaper
    than a 128-wide padded writeback for this HBM-bound kernel).
    """
    hidden = params["w1"].shape[1]
    hp = _round_up(hidden, LANE)
    ph = hp - hidden
    return {
        "w1": jnp.pad(params["w1"], ((0, 0), (0, ph))).astype(compute_dtype),
        "b1": jnp.pad(params["b1"], ((0, 0), (0, ph))).astype(jnp.float32),
        "w2": jnp.pad(params["w2"], ((0, ph), (0, ph))).astype(compute_dtype),
        "b2": jnp.pad(params["b2"], ((0, 0), (0, ph))).astype(jnp.float32),
        "w3": jnp.pad(params["w3"], ((0, ph), (0, 0))).astype(compute_dtype),
        "b3": params["b3"].astype(jnp.float32),
    }


def qnetwork_forward(x, prepared, *, block_batch=4096):
    """x: [B, input_dim] f32; prepared: output of prepare_params()."""
    B, input_dim = x.shape
    w1, b1 = prepared["w1"], prepared["b1"]
    w2, b2 = prepared["w2"], prepared["b2"]
    w3, b3 = prepared["w3"], prepared["b3"]
    HP = w1.shape[1]
    out_dim = w3.shape[1]
    compute_dtype = w1.dtype
    itemsize = jnp.dtype(compute_dtype).itemsize

    x = x.astype(compute_dtype)

    # Balanced batch tiling: >=2 tiles for moderate batches (so v7x's two
    # TensorCores both get work), even tile sizes to avoid a near-empty tail.
    min_tiles = 2 if B >= 256 else 1
    num_tiles = max(min_tiles, pl.cdiv(B, block_batch))
    TB = _round_up(pl.cdiv(B, num_tiles), SUBLANE_PACK)
    Bp = _round_up(B, TB)
    if Bp != B:  # batch-tail pad only (at most TB-1 rows, typically < 16)
        x = jnp.pad(x, ((0, Bp - B), (0, 0)))
    grid = (Bp // TB,)

    # VMEM budget: double-buffered streamed tiles + (conservatively double-
    # buffered) resident weights, capped well below v7x's 64 MiB physical VMEM.
    weight_bytes = (w1.size + w2.size + w3.size) * itemsize + 4 * (b1.size + b2.size + b3.size)
    tile_bytes = 2 * (TB * input_dim * itemsize + TB * out_dim * 4)
    vmem_limit = min(max(tile_bytes + 2 * weight_bytes + (1 << 20), 8 << 20), 48 << 20)

    cost = pl.CostEstimate(
        flops=2 * Bp * (input_dim * HP + HP * HP + HP * out_dim),
        transcendentals=0,
        bytes_accessed=Bp * input_dim * itemsize + 4 * Bp * out_dim + weight_bytes,
    )

    out = pl.pallas_call(
        qnet_kernel,
        out_shape=jax.ShapeDtypeStruct((Bp, out_dim), jnp.float32),
        grid=grid,
        in_specs=[
            pl.BlockSpec((TB, input_dim), lambda i: (i, 0)),    # x streams
            pl.BlockSpec((input_dim, HP), lambda i: (0, 0)),    # weights stay
            pl.BlockSpec((1, HP), lambda i: (0, 0)),            # resident in
            pl.BlockSpec((HP, HP), lambda i: (0, 0)),           # VMEM across
            pl.BlockSpec((1, HP), lambda i: (0, 0)),            # all grid
            pl.BlockSpec((HP, out_dim), lambda i: (0, 0)),      # iterations
            pl.BlockSpec((1, out_dim), lambda i: (0, 0)),
        ],
        out_specs=pl.BlockSpec((TB, out_dim), lambda i: (i, 0)),
        compiler_params=pltpu.CompilerParams(
            dimension_semantics=("parallel",),
            vmem_limit_bytes=vmem_limit,
        ),
        cost_estimate=cost,
    )(x, w1, b1, w2, b2, w3, b3)

    return out[:B] if Bp != B else out


def init_params(key, input_dim, output_dim, hidden=64):
    """Deterministic init mimicking PyTorch nn.Linear default (U[-1/sqrt(fan_in), +1/sqrt(fan_in)])."""
    ks = jax.random.split(key, 6)

    def linear(kw, kb, fan_in, fan_out):
        bound = 1.0 / jnp.sqrt(fan_in)
        w = jax.random.uniform(kw, (fan_in, fan_out), jnp.float32, -bound, bound)
        b = jax.random.uniform(kb, (1, fan_out), jnp.float32, -bound, bound)
        return w, b

    w1, b1 = linear(ks[0], ks[1], input_dim, hidden)
    w2, b2 = linear(ks[2], ks[3], hidden, hidden)
    w3, b3 = linear(ks[4], ks[5], hidden, output_dim)
    return {"w1": w1, "b1": b1, "w2": w2, "b2": b2, "w3": w3, "b3": b3}


def reference_forward(x, p):
    h1 = jnp.maximum(x @ p["w1"] + p["b1"], 0.0)
    h2 = jnp.maximum(h1 @ p["w2"] + p["b2"], 0.0)
    return h2 @ p["w3"] + p["b3"]


if __name__ == "__main__":
    key = jax.random.PRNGKey(0)
    k_x, k_p, k_x2 = jax.random.split(key, 3)

    input_dim, output_dim = 16, 4
    params = init_params(k_p, input_dim, output_dim)

    x = jax.random.normal(k_x, (8, input_dim), jnp.float32)
    ref = reference_forward(x, params)

    # Exact-f32 path: structural check, bit-close to the reference forward.
    out_f32 = qnetwork_forward(x, prepare_params(params, compute_dtype=jnp.float32))
    jax.block_until_ready(out_f32)
    assert out_f32.shape == (8, output_dim)
    assert jnp.allclose(out_f32, ref, atol=1e-5, rtol=1e-5)

    # Default path: bf16 matmul operands, f32 accumulate (looser tolerance).
    prepared = prepare_params(params)
    out_bf16 = qnetwork_forward(x, prepared)
    jax.block_until_ready(out_bf16)
    assert out_bf16.shape == (8, output_dim)
    assert jnp.allclose(out_bf16, ref, atol=3e-2, rtol=3e-2)

    # Ragged multi-tile batch: exercises balanced tiling, >=2 grid steps, and
    # the batch-tail pad/trim path.
    x2 = jax.random.normal(k_x2, (300, input_dim), jnp.float32)
    out2 = qnetwork_forward(x2, prepared)
    jax.block_until_ready(out2)
    assert out2.shape == (300, output_dim)
    assert jnp.allclose(out2, reference_forward(x2, params), atol=3e-2, rtol=3e-2)

    print("KERNEL_OK")
</pallas_src>

<mosaic_0001>
module attributes {stable_mosaic.version = 11 : i64} {
  func.func @qnet_kernel(%arg0: i32, %arg1: memref<16x16xf32, #tpu.memory_space<vmem>>, %arg2: memref<16x128xf32, #tpu.memory_space<vmem>>, %arg3: memref<1x128xf32, #tpu.memory_space<vmem>>, %arg4: memref<128x128xf32, #tpu.memory_space<vmem>>, %arg5: memref<1x128xf32, #tpu.memory_space<vmem>>, %arg6: memref<128x4xf32, #tpu.memory_space<vmem>>, %arg7: memref<1x4xf32, #tpu.memory_space<vmem>>, %arg8: memref<16x4xf32, #tpu.memory_space<vmem>>) attributes {dimension_semantics = [#tpu.dimension_semantics<parallel>], iteration_bounds = array<i64: 1>, scalar_prefetch = 0 : i64, scratch_operands = 0 : i64, tpu.core_type = #tpu.core_type<tc>, window_params = [{transform_indices = @transform_0, window_bounds = array<i64: 16, 16>}, {pipeline_mode = #tpu.pipeline_mode<synchronous>, transform_indices = @transform_1, window_bounds = array<i64: 16, 128>}, {pipeline_mode = #tpu.pipeline_mode<synchronous>, transform_indices = @transform_2, window_bounds = array<i64: 1, 128>}, {pipeline_mode = #tpu.pipeline_mode<synchronous>, transform_indices = @transform_3, window_bounds = array<i64: 128, 128>}, {pipeline_mode = #tpu.pipeline_mode<synchronous>, transform_indices = @transform_4, window_bounds = array<i64: 1, 128>}, {pipeline_mode = #tpu.pipeline_mode<synchronous>, transform_indices = @transform_5, window_bounds = array<i64: 128, 4>}, {pipeline_mode = #tpu.pipeline_mode<synchronous>, transform_indices = @transform_6, window_bounds = array<i64: 1, 4>}, {transform_indices = @transform_7, window_bounds = array<i64: 16, 4>}]} {
    %c0 = arith.constant 0 : index
    %c0_0 = arith.constant 0 : index
    %0 = vector.load %arg1[%c0, %c0_0] : memref<16x16xf32, #tpu.memory_space<vmem>>, vector<16x16xf32>
    %c0_1 = arith.constant 0 : index
    %c0_2 = arith.constant 0 : index
    %1 = vector.load %arg2[%c0_1, %c0_2] : memref<16x128xf32, #tpu.memory_space<vmem>>, vector<16x128xf32>
    %cst = arith.constant dense<0.000000e+00> : vector<16x128xf32>
    %2 = tpu.matmul %0, %1, %cst {dimension_numbers = #tpu.dot_dimension_numbers<[1], [0], [0], [1], [0, 0, 1, 1], [], []>} : vector<16x16xf32>, vector<16x128xf32>, vector<16x128xf32> -> vector<16x128xf32>
    %c0_3 = arith.constant 0 : index
    %c0_4 = arith.constant 0 : index
    %3 = vector.load %arg3[%c0_3, %c0_4] : memref<1x128xf32, #tpu.memory_space<vmem>>, vector<1x128xf32>
    %4 = vector.broadcast %3 : vector<1x128xf32> to vector<16x128xf32>
    %5 = arith.addf %2, %4 : vector<16x128xf32>
    %cst_5 = arith.constant 0.000000e+00 : f32
    %6 = vector.broadcast %cst_5 : f32 to vector<16x128xf32>
    %7 = arith.maximumf %5, %6 : vector<16x128xf32>
    %c0_6 = arith.constant 0 : index
    %c0_7 = arith.constant 0 : index
    %8 = vector.load %arg4[%c0_6, %c0_7] : memref<128x128xf32, #tpu.memory_space<vmem>>, vector<128x128xf32>
    %cst_8 = arith.constant dense<0.000000e+00> : vector<16x128xf32>
    %9 = tpu.matmul %7, %8, %cst_8 {dimension_numbers = #tpu.dot_dimension_numbers<[1], [0], [0], [1], [0, 0, 1, 1], [], []>} : vector<16x128xf32>, vector<128x128xf32>, vector<16x128xf32> -> vector<16x128xf32>
    %c0_9 = arith.constant 0 : index
    %c0_10 = arith.constant 0 : index
    %10 = vector.load %arg5[%c0_9, %c0_10] : memref<1x128xf32, #tpu.memory_space<vmem>>, vector<1x128xf32>
    %11 = vector.broadcast %10 : vector<1x128xf32> to vector<16x128xf32>
    %12 = arith.addf %9, %11 : vector<16x128xf32>
    %cst_11 = arith.constant 0.000000e+00 : f32
    %13 = vector.broadcast %cst_11 : f32 to vector<16x128xf32>
    %14 = arith.maximumf %12, %13 : vector<16x128xf32>
    %c0_12 = arith.constant 0 : index
    %c0_13 = arith.constant 0 : index
    %15 = vector.load %arg6[%c0_12, %c0_13] : memref<128x4xf32, #tpu.memory_space<vmem>>, vector<128x4xf32>
    %cst_14 = arith.constant dense<0.000000e+00> : vector<16x4xf32>
    %16 = tpu.matmul %14, %15, %cst_14 {dimension_numbers = #tpu.dot_dimension_numbers<[1], [0], [0], [1], [0, 0, 1, 1], [], []>} : vector<16x128xf32>, vector<128x4xf32>, vector<16x4xf32> -> vector<16x4xf32>
    %c0_15 = arith.constant 0 : index
    %c0_16 = arith.constant 0 : index
    %17 = vector.load %arg7[%c0_15, %c0_16] : memref<1x4xf32, #tpu.memory_space<vmem>>, vector<1x4xf32>
    %18 = vector.broadcast %17 : vector<1x4xf32> to vector<16x4xf32>
    %19 = arith.addf %16, %18 : vector<16x4xf32>
    %c0_17 = arith.constant 0 : index
    %c0_18 = arith.constant 0 : index
    %20 = vector.load %arg8[%c0_17, %c0_18] : memref<16x4xf32, #tpu.memory_space<vmem>>, vector<16x4xf32>
    tpu.vector_store %arg8[%c0_17, %c0_18], %19 {strides = array<i32>} : memref<16x4xf32, #tpu.memory_space<vmem>>, vector<16x4xf32>,
    return
  }
  func.func @transform_0(%arg0: i32) -> (i32, i32) {
    %c0_i32 = arith.constant 0 : i32
    %c0_i32_0 = arith.constant 0 : i32
    return %arg0, %c0_i32 : i32, i32
  }
  func.func @transform_1(%arg0: i32) -> (i32, i32) {
    %c0_i32 = arith.constant 0 : i32
    %c0_i32_0 = arith.constant 0 : i32
    %c0_i32_1 = arith.constant 0 : i32
    return %c0_i32, %c0_i32_0 : i32, i32
  }
  func.func @transform_2(%arg0: i32) -> (i32, i32) {
    %c0_i32 = arith.constant 0 : i32
    %c0_i32_0 = arith.constant 0 : i32
    %c0_i32_1 = arith.constant 0 : i32
    return %c0_i32, %c0_i32_0 : i32, i32
  }
  func.func @transform_3(%arg0: i32) -> (i32, i32) {
    %c0_i32 = arith.constant 0 : i32
    %c0_i32_0 = arith.constant 0 : i32
    %c0_i32_1 = arith.constant 0 : i32
    return %c0_i32, %c0_i32_0 : i32, i32
  }
  func.func @transform_4(%arg0: i32) -> (i32, i32) {
    %c0_i32 = arith.constant 0 : i32
    %c0_i32_0 = arith.constant 0 : i32
    %c0_i32_1 = arith.constant 0 : i32
    return %c0_i32, %c0_i32_0 : i32, i32
  }
  func.func @transform_5(%arg0: i32) -> (i32, i32) {
    %c0_i32 = arith.constant 0 : i32
    %c0_i32_0 = arith.constant 0 : i32
    %c0_i32_1 = arith.constant 0 : i32
    return %c0_i32, %c0_i32_0 : i32, i32
  }
  func.func @transform_6(%arg0: i32) -> (i32, i32) {
    %c0_i32 = arith.constant 0 : i32
    %c0_i32_0 = arith.constant 0 : i32
    %c0_i32_1 = arith.constant 0 : i32
    return %c0_i32, %c0_i32_0 : i32, i32
  }
  func.func @transform_7(%arg0: i32) -> (i32, i32) {
    %c0_i32 = arith.constant 0 : i32
    %c0_i32_0 = arith.constant 0 : i32
    return %arg0, %c0_i32 : i32, i32
  }
}

</mosaic_0001>

<bundles_post_ra>
// kernel: tpu_custom_call.1
= control target key start
LH: loop header
LB: loop body
LE: loop exit
PB: predicated region body
PF: predicated region fallthrough
CT: control target
= control target key end

     0   :  { %12 = vsyncpa [#allocation3], 0  ;;  %s689_s0 = inlined_call_operand.hbm [shape: f32[16,16], index: 0, kind: input, shape index: {}]   ;;  %s690_s1 = inlined_call_operand.hbm [shape: f32[16,128], index: 1, kind: input, shape index: {}]   ;;  %s691_s2 = inlined_call_operand.vmem [shape: f32[1,128], index: 2, kind: input, shape index: {}]   ;;  %s692_s3 = inlined_call_operand.vmem [shape: f32[128,128], index: 3, kind: input, shape index: {}]   ;;  %s693_s4 = inlined_call_operand.vmem [shape: f32[1,128], index: 4, kind: input, shape index: {}]   ;;  %s694_s5 = inlined_call_operand.vmem [shape: f32[128,4], index: 5, kind: input, shape index: {}]   ;;  %s695_s6 = inlined_call_operand.vmem [shape: f32[1,4], index: 6, kind: input, shape index: {}]   ;;  %s696_s7 = inlined_call_operand.vmem [shape: f32[16,4], index: 7, kind: output, shape index: {}]  }
   0x1   :  { %13 = vsyncpa [#allocation5], 0  ;;  %s526_s24 = smov [#allocation2]  }
   0x2   :  { %s19_s25 = sshll.u32 %s526_s24, 4  ;;  %s20_s25 = int_to_ptr.vmem [resolvable:$true] %s19_s25 }
   0x3   :  { %s490_s26 = scalar_lea.vmem %s20_s25, 256  ;;  %p495_p1 = scmp.lt.s32.totalorder %s20_s25, %s20_s25 }
   0x4   :  { %p491_p0 = scmp.ne.s32.totalorder %s20_s25, %s490_s26  ;;  %p496_p2 = scmp.lt.s32.totalorder %s490_s26, %s490_s26 }
   0x6   :  { %p497_p3 = por %p496_p2, %p495_p1 }
   0x8   :  { %p498_p4 = pnand %p497_p3, %p491_p0 }
   0xa   :  { %501 = shalt.err (!%p498_p4)
}
   0xb   :  { %s527_s27 = smov 128   ;;  %s528_s28 = smov 8  }
   0xc   :  { %25 = dma.hbm_to_vmem [thread:$0]  %s689_s0, 256, %s20_s25, [#allocation3], %s527_s27, %s527_s27, %s528_s28  }
   0xd   :  { %s529_s8 = smov [#allocation4]  }
   0xe   :  { %s31_s9 = sshll.u32 %s529_s8, 4  ;;  %s32_s9 = int_to_ptr.vmem [resolvable:$true] %s31_s9 }
   0xf   :  { %s510_s10 = scalar_lea.vmem %s32_s9, 256  ;;  %p515_p6 = scmp.lt.s32.totalorder %s32_s9, %s32_s9 }
  0x10   :  { %p511_p5 = scmp.ne.s32.totalorder %s32_s9, %s510_s10  ;;  %p516_p7 = scmp.lt.s32.totalorder %s510_s10, %s510_s10 }
  0x12   :  { %p517_p8 = por %p516_p7, %p515_p6 }
  0x14   :  { %p518_p9 = pnand %p517_p8, %p511_p5 }
  0x16   :  { %521 = shalt.err (!%p518_p9)
}
  0x17   :  { %37 = dma.hbm_to_vmem [thread:$0]  %s690_s1, 256, %s32_s9, [#allocation5], %s527_s27, %s527_s27, %s528_s28  }
  0x18   :  { %522 = dma.done.wait [#allocation3], 256  }
  0x19   :  { %523 = vsyncadd [#allocation3], 4294967040 }
  0x1a   :  { %524 = dma.done.wait [#allocation5], 256  }
  0x1b   :  { %525 = vsyncadd [#allocation5], 4294967040  ;;  %vm65_vm0 = vcmask 130048   ;;  %v57_v0 = vld [vmem:[#allocation4 + $0x8] sm:$0xff]  ;;  %v56_v1 = vld [vmem:[#allocation4] sm:$0xff]  ;;  %vm347_vm1 = vcmask 31744  }
  0x1c   :  { %v54_v2 = vld [vmem:[#allocation2] sm:$0xff]  ;;  %401 = vmatprep.subr.mxu0 %v57_v0  ;;  %v164_v3 = vld [vmem:[%s692_s3 + $0x78] sm:$0xff]  ;;  %v163_v4 = vld [vmem:[%s692_s3 + $0x70] sm:$0xff] }
  0x1d   :  { %405 = vmatprep.mubr.msk.f32.mxu0 %vm65_vm0, %v54_v2  ;;  %402 = vmatpush3.msra.mxu0 %v57_v0  ;;  %v55_v5 = vld [vmem:[#allocation2 + $0x8] sm:$0xff]  ;;  %v161_v7 = vld [vmem:[%s692_s3 + $0x60] sm:$0xff]  ;;  %v160_v8 = vld [vmem:[%s692_s3 + $0x58] sm:$0xff] }
  0x1e   :  { %408 = vmatprep.subr.mxu1 %v164_v3  ;;  %403 = vmatprep.subr.mxu0 %v56_v1  ;;  %v162_v6 = vld [vmem:[%s692_s3 + $0x68] sm:$0xff]  ;;  %v159_v9 = vld [vmem:[%s692_s3 + $0x50] sm:$0xff]  ;;  %v157_v11 = vld [vmem:[%s692_s3 + $0x40] sm:$0xff] }
  0x1f   :  { %409 = vmatpush3.msra.mxu1 %v164_v3  ;;  %404 = vmatpush3.msra.mxu0 %v56_v1  ;;  %v158_v10 = vld [vmem:[%s692_s3 + $0x48] sm:$0xff]  ;;  %v156_v12 = vld [vmem:[%s692_s3 + $0x38] sm:$0xff]  ;;  %v155_v13 = vld [vmem:[%s692_s3 + $0x30] sm:$0xff] }
  0x20   :  { %410 = vmatprep.subr.mxu1 %v163_v4  ;;  %406 = vmatmul.mubr.msk.f32.vlgmr.msra.gmra.mxu0 %vm65_vm0, %v55_v5  ;;  %v154_v14 = vld [vmem:[%s692_s3 + $0x28] sm:$0xff]  ;;  %v153_v15 = vld [vmem:[%s692_s3 + $0x20] sm:$0xff]  ;;  %v152_v16 = vld [vmem:[%s692_s3 + $0x18] sm:$0xff] }
  0x21   :  { %411 = vmatpush3.msra.mxu1 %v163_v4  ;;  %v151_v17 = vld [vmem:[%s692_s3 + $0x10] sm:$0xff]  ;;  %v150_v18 = vld [vmem:[%s692_s3 + $0x8] sm:$0xff]  ;;  %v149_v19 = vld [vmem:[%s692_s3] sm:$0xff] }
  0x22   :  { %412 = vmatprep.subr.mxu1 %v162_v6  ;;  %v264_v20 = vld [vmem:[%s694_s5 + $0x78] sm:$0xff]  ;;  %v263_v21 = vld [vmem:[%s694_s5 + $0x70] sm:$0xff]  ;;  %v262_v22 = vld [vmem:[%s694_s5 + $0x68] sm:$0xff] }
  0x23   :  { %413 = vmatpush3.msra.mxu1 %v162_v6  ;;  %443 = vmatprep.subr.mxu0 %v264_v20  ;;  %v261_v23 = vld [vmem:[%s694_s5 + $0x60] sm:$0xff]  ;;  %v260_v24 = vld [vmem:[%s694_s5 + $0x58] sm:$0xff]  ;;  %v259_v25 = vld [vmem:[%s694_s5 + $0x50] sm:$0xff] }
  0x24   :  { %414 = vmatprep.subr.mxu1 %v161_v7  ;;  %444 = vmatpush3.msra.mxu0 %v264_v20  ;;  %v258_v26 = vld [vmem:[%s694_s5 + $0x48] sm:$0xff]  ;;  %v257_v27 = vld [vmem:[%s694_s5 + $0x40] sm:$0xff]  ;;  %v256_v28 = vld [vmem:[%s694_s5 + $0x38] sm:$0xff] }
  0x25   :  { %415 = vmatpush3.msra.mxu1 %v161_v7  ;;  %445 = vmatprep.subr.mxu0 %v263_v21  ;;  %v255_v29 = vld [vmem:[%s694_s5 + $0x30] sm:$0xff]  ;;  %v254_v30 = vld [vmem:[%s694_s5 + $0x28] sm:$0xff]  ;;  %v253_v31 = vld [vmem:[%s694_s5 + $0x20] sm:$0xff] }
  0x26   :  { %416 = vmatprep.subr.mxu1 %v160_v8  ;;  %446 = vmatpush3.msra.mxu0 %v263_v21  ;;  %v356_v32 = vld [vmem:[%s691_s2] ss:$0 sm:$0xff]  ;;  %v252_v39 = vld [vmem:[%s694_s5 + $0x18] sm:$0xff]  ;;  %v251_v40 = vld [vmem:[%s694_s5 + $0x10] sm:$0xff] }
  0x27   :  { %417 = vmatpush3.msra.mxu1 %v160_v8  ;;  %447 = vmatprep.subr.mxu0 %v262_v22  ;;  %v250_v41 = vld [vmem:[%s694_s5 + $0x8] sm:$0xff]  ;;  %v249_v42 = vld [vmem:[%s694_s5] sm:$0xff] }
  0x28   :  { %418 = vmatprep.subr.mxu1 %v159_v9  ;;  %448 = vmatpush3.msra.mxu0 %v262_v22  ;;  %v359_v43 = vld [vmem:[%s693_s4] ss:$0 sm:$0xff] }
  0x29   :  { %419 = vmatpush3.msra.mxu1 %v159_v9  ;;  %449 = vmatprep.subr.mxu0 %v261_v23  ;;  %v360_v50 = vld [vmem:[%s695_s6] ss:$0 sm:$0xff] }
  0x2a   :  { %420 = vmatprep.subr.mxu1 %v158_v10  ;;  %450 = vmatpush3.msra.mxu0 %v261_v23 }
  0x2b   :  { %421 = vmatpush3.msra.mxu1 %v158_v10  ;;  %451 = vmatprep.subr.mxu0 %v260_v24 }
  0x2c   :  { %422 = vmatprep.subr.mxu1 %v157_v11  ;;  %452 = vmatpush3.msra.mxu0 %v260_v24 }
  0x2d   :  { %423 = vmatpush3.msra.mxu1 %v157_v11  ;;  %453 = vmatprep.subr.mxu0 %v259_v25 }
  0x2e   :  { %424 = vmatprep.subr.mxu1 %v156_v12  ;;  %454 = vmatpush3.msra.mxu0 %v259_v25 }
  0x2f   :  { %425 = vmatpush3.msra.mxu1 %v156_v12  ;;  %455 = vmatprep.subr.mxu0 %v258_v26 }
  0x30   :  { %426 = vmatprep.subr.mxu1 %v155_v13  ;;  %456 = vmatpush3.msra.mxu0 %v258_v26 }
  0x31   :  { %427 = vmatpush3.msra.mxu1 %v155_v13  ;;  %457 = vmatprep.subr.mxu0 %v257_v27 }
  0x32   :  { %428 = vmatprep.subr.mxu1 %v154_v14  ;;  %458 = vmatpush3.msra.mxu0 %v257_v27 }
  0x33   :  { %429 = vmatpush3.msra.mxu1 %v154_v14  ;;  %459 = vmatprep.subr.mxu0 %v256_v28 }
  0x34   :  { %430 = vmatprep.subr.mxu1 %v153_v15  ;;  %460 = vmatpush3.msra.mxu0 %v256_v28 }
  0x35   :  { %431 = vmatpush3.msra.mxu1 %v153_v15  ;;  %461 = vmatprep.subr.mxu0 %v255_v29 }
  0x36   :  { %432 = vmatprep.subr.mxu1 %v152_v16  ;;  %462 = vmatpush3.msra.mxu0 %v255_v29 }
  0x37   :  { %433 = vmatpush3.msra.mxu1 %v152_v16  ;;  %463 = vmatprep.subr.mxu0 %v254_v30 }
  0x38   :  { %434 = vmatprep.subr.mxu1 %v151_v17  ;;  %464 = vmatpush3.msra.mxu0 %v254_v30 }
  0x39   :  { %435 = vmatpush3.msra.mxu1 %v151_v17  ;;  %465 = vmatprep.subr.mxu0 %v253_v31 }
  0x3a   :  { %436 = vmatprep.subr.mxu1 %v150_v18  ;;  %466 = vmatpush3.msra.mxu0 %v253_v31 }
  0x3b   :  { %437 = vmatpush3.msra.mxu1 %v150_v18  ;;  %467 = vmatprep.subr.mxu0 %v252_v39 }
  0x3c   :  { %438 = vmatprep.subr.mxu1 %v149_v19  ;;  %468 = vmatpush3.msra.mxu0 %v252_v39 }
  0x3d   :  { %439 = vmatpush3.msra.mxu1 %v149_v19  ;;  %469 = vmatprep.subr.mxu0 %v251_v40 }
  0x3e   :  { %470 = vmatpush3.msra.mxu0 %v251_v40 }
  0x3f   :  { %471 = vmatprep.subr.mxu0 %v250_v41 }
  0x40   :  { %472 = vmatpush3.msra.mxu0 %v250_v41 }
  0x41   :  { %473 = vmatprep.subr.mxu0 %v249_v42 }
  0x42   :  { %474 = vmatpush3.msra.mxu0 %v249_v42 }
  0xe0   :  { %v407_v33 = vpop.f32.mrf.mxu0 }
  0xe1   :  { %v144_v34 = vadd.f32 %v407_v33, %v356_v32 }
  0xe2   :  { %v138_v35 = vpop.f32.mrf.mxu0 }
  0xe3   :  { %v139_v36 = vadd.f32 %v356_v32, %v138_v35  ;;  %v148_v38 = vmax.f32 %v144_v34, 0.0 }
  0xe5   :  { %v147_v37 = vmax.f32 %v139_v36, 0.0 }
  0xe7   :  { %440 = vmatprep.mubr.f32.mxu1 %v147_v37 }
  0xe8   :  { %441 = vmatmul.mubr.f32.vlgmr.msra.gmra.mxu1 %v148_v38 }
 0x1a8   :  { %v442_v44 = vpop.f32.mrf.mxu1 }
 0x1a9   :  { %v244_v45 = vadd.f32 %v442_v44, %v359_v43 }
 0x1aa   :  { %v238_v46 = vpop.f32.mrf.mxu1 }
 0x1ab   :  { %v239_v47 = vadd.f32 %v359_v43, %v238_v46  ;;  %v248_v49 = vmax.f32 %v244_v45, 0.0 }
 0x1ad   :  { %v247_v48 = vmax.f32 %v239_v47, 0.0 }
 0x1af   :  { %475 = vmatprep.mubr.f32.mxu0 %v247_v48 }
 0x1b0   :  { %476 = vmatmul.mubr.f32.vlgmr.msra.gmra.mxu0 %v248_v49 }
 0x270   :  { %v477_v51 = vpop.f32.mrf.mxu0 }
 0x271   :  { %v344_v52 = vadd.f32 %v477_v51, %v360_v50 }
 0x272   :  { %v338_v53 = vpop.f32.mrf.mxu0 }
 0x273   :  { %349 = vst.msk [vmem:[%s696_s7 + $0x8] sm:$0xff] %vm347_vm1, %v344_v52  ;;  %v339_v54 = vadd.f32 %v360_v50, %v338_v53 }
 0x275   :  { %348 = vst.msk [vmem:[%s696_s7] sm:$0xff] %vm347_vm1, %v339_v54 }
 0x276   :  { %354 = vsyncpa [#allocation3], 1 }
 0x277   :  { %355 = vsyncpa [#allocation5], 1 }

</bundles_post_ra>
